<compile_context>
chip_gen: v6e
topology: v6e:2x2x1
jax: 0.10.0
libtpu: 0.0.40
codegen_flags: <defaults>
</compile_context>

<pallas_src>
import functools

import jax
import jax.numpy as jnp
from jax.experimental import pallas as pl
from jax.experimental.pallas import tpu as pltpu

TEMP = 0.5
NUM_COLS = 61  # hard-coded loop count in the PyTorch module


def _infonce_kernel(x_ref, mask_ref, out_ref, *, num_stocks):
    xf = x_ref[...].astype(jnp.float32)                 # (B*N, D), lane-dense
    bn = xf.shape[0]
    nbatch = bn // num_stocks
    inv_temp = jnp.float32(1.0 / TEMP)
    zero = jnp.float32(0.0)

    # One full-width MXU pass: scores[p, q] = <x_flat[p], x_flat[q]> / temp.
    scores = jax.lax.dot_general(
        xf, xf, (((1,), (1,)), ((), ())),
        preferred_element_type=jnp.float32) * inv_temp  # (BN, BN)
    e = jnp.exp(scores)                                 # (BN, BN), lane-dense EUP work

    row = jax.lax.broadcasted_iota(jnp.int32, (bn, bn), 0)
    col = jax.lax.broadcasted_iota(jnp.int32, (bn, bn), 1)

    # Positive logit = exp(Gram diagonal), extracted with an eye-mask sublane
    # reduce (identical arithmetic to PyTorch's exp(matmul(out_i, out_i^T)/temp)).
    pos = jnp.sum(jnp.where(row == col, e, zero), axis=0, keepdims=True)          # (1, BN)
    # Negatives: block-diagonal mask (same batch AND adj[j, i] == 0). Select,
    # not multiply, so overflowed exp entries never produce inf*0 -> NaN.
    neg = jnp.sum(jnp.where(mask_ref[...] != 0, e, zero), axis=0, keepdims=True)  # (1, BN)

    # Same arithmetic as PyTorch: -log(pos / neg). Overflow / empty-mask cases
    # become inf/NaN and drop the column below, exactly like the reference.
    nce = -jnp.log(pos / neg)                           # (1, BN), index q = b*N + i

    # Fold batch halves: per_col[i] = sum_b nce[b*N + i].
    per_col = nce[:, 0:num_stocks]
    for b in range(1, nbatch):
        per_col = per_col + nce[:, b * num_stocks:(b + 1) * num_stocks]

    # Keep only the first 61 columns whose batch-sum is finite.
    ci = jax.lax.broadcasted_iota(jnp.int32, (1, num_stocks), 1)
    finite = jnp.abs(per_col) < jnp.float32(jnp.inf)    # False for +-inf and NaN
    keep = (ci < NUM_COLS) & finite
    total = jnp.sum(jnp.where(keep, per_col, zero), axis=1, keepdims=True)  # (1, 1)
    out_ref[...] = total * jnp.float32(1.0 / bn)        # / stock / batch


def infonce_loss(hgat_output, adj):
    """hgat_output: (batch, stock, dim); adj: (stock, stock) int. Returns scalar loss."""
    B, N, D = hgat_output.shape
    assert N >= NUM_COLS, f"module iterates {NUM_COLS} columns; got stock={N}"
    BN = B * N

    x_flat = hgat_output.reshape(BN, D)                 # free, contiguous reshape
    # Block-diagonal negatives mask: mask[b*N+j, b'*N+i] = (b == b') & (adj[j,i]==0).
    adjm = (adj == 0)
    eye_b = jnp.eye(B, dtype=jnp.bool_)
    mask_bd = (eye_b[:, None, :, None] & adjm[None, :, None, :]).reshape(BN, BN)
    mask_bd = mask_bd.astype(jnp.int32)

    kernel = functools.partial(_infonce_kernel, num_stocks=N)
    out = pl.pallas_call(
        kernel,
        out_shape=jax.ShapeDtypeStruct((1, 1), jnp.float32),
        in_specs=[pl.BlockSpec(memory_space=pltpu.MemorySpace.VMEM),
                  pl.BlockSpec(memory_space=pltpu.MemorySpace.VMEM)],
        out_specs=pl.BlockSpec(memory_space=pltpu.MemorySpace.VMEM),
        cost_estimate=pl.CostEstimate(
            flops=2 * BN * BN * D,
            transcendentals=BN * BN + BN,
            bytes_accessed=4 * (BN * D + BN * BN + 1)),
    )(x_flat, mask_bd)
    return out[0, 0]


if __name__ == "__main__":
    key = jax.random.PRNGKey(0)
    k1, k2 = jax.random.split(key)

    # stock must be >= 61 because the module iterates 61 columns of adj
    B, N, D = 2, 64, 32
    x = jax.random.normal(k1, (B, N, D), dtype=jnp.float32)
    adj = (jax.random.uniform(k2, (N, N)) > 0.5).astype(jnp.int32)

    loss = infonce_loss(x, adj)
    jax.block_until_ready(loss)

    # Pure-JAX reference mirroring the PyTorch loop (the random permutation of
    # negatives does not affect the sum, so it is omitted).
    ref = 0.0
    for i in range(NUM_COLS):
        mask_i = (adj[:, i] == 0)
        xi = x[:, i, :]                                              # (B, D)
        pos = jnp.exp(jnp.sum(xi * xi, axis=-1) / TEMP)              # (B,)
        sims = jnp.einsum('bd,bnd->bn', xi, x) / TEMP                # (B, N)
        neg = jnp.sum(jnp.where(mask_i[None, :], jnp.exp(sims), 0.0), axis=-1)
        li = jnp.sum(-jnp.log(pos / neg))
        ref = ref + jnp.where(jnp.isfinite(li), li, 0.0)
    ref = ref / N / B

    assert jnp.allclose(loss, ref, rtol=1e-4, atol=1e-4), (loss, ref)
    print("KERNEL_OK")
</pallas_src>

<mosaic_0001>
module attributes {stable_mosaic.version = 11 : i64} {
  func.func @_infonce_kernel(%arg0: memref<128x32xf32, #tpu.memory_space<vmem>>, %arg1: memref<128x128xi32, #tpu.memory_space<vmem>>, %arg2: memref<1x1xf32, #tpu.memory_space<vmem>>) attributes {dimension_semantics = [], scalar_prefetch = 0 : i64, scratch_operands = 0 : i64, tpu.core_type = #tpu.core_type<tc>} {
    %c0 = arith.constant 0 : index
    %c0_0 = arith.constant 0 : index
    %0 = vector.load %arg0[%c0, %c0_0] : memref<128x32xf32, #tpu.memory_space<vmem>>, vector<128x32xf32>
    %cst = arith.constant dense<0.000000e+00> : vector<128x128xf32>
    %1 = tpu.matmul %0, %0, %cst {dimension_numbers = #tpu.dot_dimension_numbers<[1], [1], [0], [0], [0, 0, 1, 0], [], []>} : vector<128x32xf32>, vector<128x32xf32>, vector<128x128xf32> -> vector<128x128xf32>
    %cst_1 = arith.constant 2.000000e+00 : f32
    %2 = vector.broadcast %cst_1 : f32 to vector<128x128xf32>
    %3 = arith.mulf %1, %2 : vector<128x128xf32>
    %4 = math.exp %3 : vector<128x128xf32>
    %5 = tpu.iota {dimensions = array<i32: 0>} : vector<128x128xi32>
    %6 = tpu.iota {dimensions = array<i32: 1>} : vector<128x128xi32>
    %7 = arith.cmpi eq, %5, %6 : vector<128x128xi32>
    %cst_2 = arith.constant 0.000000e+00 : f32
    %8 = vector.broadcast %cst_2 : f32 to vector<128x128xf32>
    %9 = arith.select %7, %4, %8 : vector<128x128xi1>, vector<128x128xf32>
    %cst_3 = arith.constant dense<0.000000e+00> : vector<128xf32>
    %10 = vector.multi_reduction <add>, %9, %cst_3 [0] : vector<128x128xf32> to vector<128xf32>
    %11 = vector.shape_cast %10 : vector<128xf32> to vector<1x128xf32>
    %c0_4 = arith.constant 0 : index
    %c0_5 = arith.constant 0 : index
    %12 = vector.load %arg1[%c0_4, %c0_5] : memref<128x128xi32, #tpu.memory_space<vmem>>, vector<128x128xi32>
    %c0_i32 = arith.constant 0 : i32
    %13 = vector.broadcast %c0_i32 : i32 to vector<128x128xi32>
    %14 = arith.cmpi ne, %12, %13 : vector<128x128xi32>
    %cst_6 = arith.constant 0.000000e+00 : f32
    %15 = vector.broadcast %cst_6 : f32 to vector<128x128xf32>
    %16 = arith.select %14, %4, %15 : vector<128x128xi1>, vector<128x128xf32>
    %cst_7 = arith.constant dense<0.000000e+00> : vector<128xf32>
    %17 = vector.multi_reduction <add>, %16, %cst_7 [0] : vector<128x128xf32> to vector<128xf32>
    %18 = vector.shape_cast %17 : vector<128xf32> to vector<1x128xf32>
    %19 = arith.divf %11, %18 : vector<1x128xf32>
    %20 = math.log %19 : vector<1x128xf32>
    %cst_8 = arith.constant 0.000000e+00 : f32
    %21 = vector.broadcast %cst_8 : f32 to vector<1x128xf32>
    %22 = arith.subf %21, %20 : vector<1x128xf32>
    %23 = vector.extract_strided_slice %22 {offsets = [0, 0], sizes = [1, 64], strides = [1, 1]} : vector<1x128xf32> to vector<1x64xf32>
    %24 = vector.extract_strided_slice %22 {offsets = [0, 64], sizes = [1, 64], strides = [1, 1]} : vector<1x128xf32> to vector<1x64xf32>
    %25 = arith.addf %23, %24 : vector<1x64xf32>
    %26 = tpu.iota {dimensions = array<i32: 1>} : vector<1x64xi32>
    %27 = math.absf %25 : vector<1x64xf32>
    %cst_9 = arith.constant 0x7F800000 : f32
    %28 = vector.broadcast %cst_9 : f32 to vector<1x64xf32>
    %29 = arith.cmpf olt, %27, %28 : vector<1x64xf32>
    %c61_i32 = arith.constant 61 : i32
    %30 = vector.broadcast %c61_i32 : i32 to vector<1x64xi32>
    %31 = arith.cmpi slt, %26, %30 : vector<1x64xi32>
    %32 = arith.andi %31, %29 : vector<1x64xi1>
    %cst_10 = arith.constant 0.000000e+00 : f32
    %33 = vector.broadcast %cst_10 : f32 to vector<1x64xf32>
    %34 = arith.select %32, %25, %33 : vector<1x64xi1>, vector<1x64xf32>
    %cst_11 = arith.constant dense<0.000000e+00> : vector<1xf32>
    %35 = vector.multi_reduction <add>, %34, %cst_11 [1] : vector<1x64xf32> to vector<1xf32>
    %36 = vector.shape_cast %35 : vector<1xf32> to vector<1x1xf32>
    %cst_12 = arith.constant 7.812500e-03 : f32
    %37 = vector.broadcast %cst_12 : f32 to vector<1x1xf32>
    %38 = arith.mulf %36, %37 : vector<1x1xf32>
    %c0_13 = arith.constant 0 : index
    %c0_14 = arith.constant 0 : index
    %39 = vector.load %arg2[%c0_13, %c0_14] : memref<1x1xf32, #tpu.memory_space<vmem>>, vector<1x1xf32>
    tpu.vector_store %arg2[%c0_13, %c0_14], %38 {strides = array<i32>} : memref<1x1xf32, #tpu.memory_space<vmem>>, vector<1x1xf32>,
    return
  }
}

</mosaic_0001>

<bundles_post_ra>
// kernel: tpu_custom_call.1
= control target key start
LH: loop header
LB: loop body
LE: loop exit
PB: predicated region body
PF: predicated region fallthrough
CT: control target
= control target key end

     0   :  { %vm28_vm0 = vcmask 261120   ;;  %s965_s0 = inlined_call_operand.vmem [shape: f32[128,32], index: 0, kind: input, shape index: {}]   ;;  %s966_s1 = inlined_call_operand.vmem [shape: s32[128,128], index: 1, kind: input, shape index: {}]   ;;  %s967_s2 = inlined_call_operand.hbm [shape: f32[1,1], index: 2, kind: output, shape index: {}]  }
   0x1   :  { %v679_v0 = vld [vmem:[%s965_s0 + $0x78] sm:$0xff]  ;;  %v684_v1 = vld [vmem:[%s965_s0 + $0x70] sm:$0xff]  ;;  %v20_v2 = vld [vmem:[%s965_s0 + $0x40] sm:$0xff] }
   0x2   :  { %511 = vmatprep.subr.msk.mxu0 %vm28_vm0, %v679_v0  ;;  %567 = vmatprep.subr.msk.mxu1 %vm28_vm0, %v679_v0  ;;  %v704_v3 = vld [vmem:[%s965_s0 + $0x68] sm:$0xff] }
   0x3   :  { %512 = vmatpush3.xpose.msk.msra.mxu0 %vm28_vm0, %v679_v0  ;;  %583 = vmatpush3.xpose.msk.msra.mxu1 %vm28_vm0, %v679_v0 }
   0x4   :  { %513 = vmatprep.subr.msk.mxu0 %vm28_vm0, %v684_v1  ;;  %568 = vmatprep.subr.msk.mxu1 %vm28_vm0, %v684_v1 }
   0x5   :  { %555 = vmatprep.mubr.msk.f32.mxu1 %vm28_vm0, %v20_v2 }
   0x6   :  { %7 = vsyncpa [#allocation3], 0  ;;  %v718_v4 = vld [vmem:[%s965_s0] sm:$0xff]  ;;  %v738_v6 = vld [vmem:[%s965_s0 + $0x58] sm:$0xff]  ;;  %v270_v23 = vlaneseq  ;;  %s660_s15 = smov [#allocation2]  }
   0x7   :  { %514 = vmatpush3.xpose.msk.msra.mxu0 %vm28_vm0, %v684_v1  ;;  %584 = vmatpush3.xpose.msk.msra.mxu1 %vm28_vm0, %v684_v1  ;;  %v723_v5 = vld [vmem:[%s965_s0 + $0x60] sm:$0xff]  ;;  %v22_v7 = vld [vmem:[%s965_s0 + $0x50] sm:$0xff]  ;;  %v21_v8 = vld [vmem:[%s965_s0 + $0x48] sm:$0xff]  ;;  %s439_s16 = sshll.u32 %s660_s15, 4  ;;  %s440_s16 = int_to_ptr.vmem [resolvable:$true] %s439_s16 }
   0x8   :  { %515 = vmatprep.subr.msk.mxu0 %vm28_vm0, %v704_v3  ;;  %569 = vmatprep.subr.msk.mxu1 %vm28_vm0, %v704_v3  ;;  %v19_v9 = vld [vmem:[%s965_s0 + $0x38] sm:$0xff]  ;;  %v18_v10 = vld [vmem:[%s965_s0 + $0x30] sm:$0xff]  ;;  %v17_v11 = vld [vmem:[%s965_s0 + $0x28] sm:$0xff]  ;;  %v846_v32 = vshrl.u32 %v270_v23, 7  ;;  %v849_v41 = vand.u32 127, %v270_v23  ;;  %s637_s17 = scalar_lea.vmem %s440_s16, 16  ;;  %p642_p1 = scmp.lt.s32.totalorder %s440_s16, %s440_s16 }
   0x9   :  { %543 = vmatprep.mubr.msk.f32.mxu0 %vm28_vm0, %v718_v4  ;;  %v16_v12 = vld [vmem:[%s965_s0 + $0x20] sm:$0xff]  ;;  %v15_v13 = vld [vmem:[%s965_s0 + $0x18] sm:$0xff]  ;;  %v14_v14 = vld [vmem:[%s965_s0 + $0x10] sm:$0xff]  ;;  %p638_p0 = scmp.ne.s32.totalorder %s440_s16, %s637_s17  ;;  %s641_s18 = scalar_lea.vmem %s440_s16, 32 }
   0xa   :  { %v13_v15 = vld [vmem:[%s965_s0 + $0x8] sm:$0xff]  ;;  %v272_v40 = vadd.s32 8, %v846_v32  ;;  %v855_v47 = vadd.s32 24, %v846_v32  ;;  %v342_v50 = vld [vmem:[%s966_s1] sm:$0xff]  ;;  %v345_v54 = vld [vmem:[%s966_s1 + $0x18] sm:$0xff]  ;;  %v273_v55 = vadd.s32 16, %v846_v32  ;;  %vm289_vm3 = vcmp.eq.s32.totalorder %v846_v32, %v849_v41  ;;  %p643_p2 = scmp.lt.s32.totalorder %s641_s18, %s637_s17 }
   0xb   :  { %516 = vmatpush3.xpose.msk.msra.mxu0 %vm28_vm0, %v704_v3  ;;  %585 = vmatpush3.xpose.msk.msra.mxu1 %vm28_vm0, %v704_v3  ;;  %v343_v46 = vld [vmem:[%s966_s1 + $0x8] sm:$0xff]  ;;  %v866_v56 = vadd.s32 40, %v846_v32  ;;  %v344_v58 = vld [vmem:[%s966_s1 + $0x10] sm:$0xff]  ;;  %vm358_vm4 = vcmp.ne.s32.totalorder %v342_v50, 0  ;;  %v275_v61 = vadd.s32 32, %v846_v32  ;;  %vm361_vm6 = vcmp.ne.s32.totalorder %v345_v54, 0 }
   0xc   :  { %517 = vmatprep.subr.msk.mxu0 %vm28_vm0, %v723_v5  ;;  %570 = vmatprep.subr.msk.mxu1 %vm28_vm0, %v723_v5  ;;  %vm290_vm1 = vcmp.eq.s32.totalorder %v272_v40, %v849_v41  ;;  %vm359_vm2 = vcmp.ne.s32.totalorder %v343_v46, 0  ;;  %vm292_vm5 = vcmp.eq.s32.totalorder %v855_v47, %v849_v41  ;;  %vm291_vm7 = vcmp.eq.s32.totalorder %v273_v55, %v849_v41  ;;  %v350_v47 = vld [vmem:[%s966_s1 + $0x40] sm:$0xff]  ;;  %v351_v55 = vld [vmem:[%s966_s1 + $0x48] sm:$0xff]  ;;  %p644_p3 = por %p643_p2, %p642_p1 }
   0xd   :  { %vm360_vm8 = vcmp.ne.s32.totalorder %v344_v58, 0  ;;  %vm294_vm9 = vcmp.eq.s32.totalorder %v866_v56, %v849_v41  ;;  %vm293_vm11 = vcmp.eq.s32.totalorder %v275_v61, %v849_v41 }
   0xe   :  { %p645_p4 = pnand %p644_p3, %p638_p0 }
   0xf   :  { %518 = vmatpush3.xpose.msk.msra.mxu0 %vm28_vm0, %v723_v5  ;;  %586 = vmatpush3.xpose.msk.msra.mxu1 %vm28_vm0, %v723_v5 }
  0x10   :  { %519 = vmatprep.subr.msk.mxu0 %vm28_vm0, %v738_v6  ;;  %571 = vmatprep.subr.msk.mxu1 %vm28_vm0, %v738_v6 }
  0x13   :  { %520 = vmatpush3.xpose.msk.msra.mxu0 %vm28_vm0, %v738_v6  ;;  %587 = vmatpush3.xpose.msk.msra.mxu1 %vm28_vm0, %v738_v6 }
  0x14   :  { %521 = vmatprep.subr.msk.mxu0 %vm28_vm0, %v22_v7  ;;  %572 = vmatprep.subr.msk.mxu1 %vm28_vm0, %v22_v7 }
  0x17   :  { %522 = vmatpush3.xpose.msk.msra.mxu0 %vm28_vm0, %v22_v7  ;;  %588 = vmatpush3.xpose.msk.msra.mxu1 %vm28_vm0, %v22_v7 }
  0x18   :  { %523 = vmatprep.subr.msk.mxu0 %vm28_vm0, %v21_v8  ;;  %573 = vmatprep.subr.msk.mxu1 %vm28_vm0, %v21_v8 }
  0x1b   :  { %524 = vmatpush3.xpose.msk.msra.mxu0 %vm28_vm0, %v21_v8  ;;  %589 = vmatpush3.xpose.msk.msra.mxu1 %vm28_vm0, %v21_v8 }
  0x1c   :  { %525 = vmatprep.subr.msk.mxu0 %vm28_vm0, %v20_v2  ;;  %574 = vmatprep.subr.msk.mxu1 %vm28_vm0, %v20_v2 }
  0x1f   :  { %526 = vmatpush3.xpose.msk.msra.mxu0 %vm28_vm0, %v20_v2  ;;  %590 = vmatpush3.xpose.msk.msra.mxu1 %vm28_vm0, %v20_v2  ;;  %v346_v2 = vld [vmem:[%s966_s1 + $0x20] sm:$0xff] }
  0x20   :  { %527 = vmatprep.subr.msk.mxu0 %vm28_vm0, %v19_v9  ;;  %575 = vmatprep.subr.msk.mxu1 %vm28_vm0, %v19_v9  ;;  %vm362_vm12 = vcmp.ne.s32.totalorder %v346_v2, 0 }
  0x23   :  { %528 = vmatpush3.xpose.msk.msra.mxu0 %vm28_vm0, %v19_v9  ;;  %591 = vmatpush3.xpose.msk.msra.mxu1 %vm28_vm0, %v19_v9 }
  0x24   :  { %529 = vmatprep.subr.msk.mxu0 %vm28_vm0, %v18_v10  ;;  %576 = vmatprep.subr.msk.mxu1 %vm28_vm0, %v18_v10 }
  0x27   :  { %530 = vmatpush3.xpose.msk.msra.mxu0 %vm28_vm0, %v18_v10  ;;  %592 = vmatpush3.xpose.msk.msra.mxu1 %vm28_vm0, %v18_v10 }
  0x28   :  { %531 = vmatprep.subr.msk.mxu0 %vm28_vm0, %v17_v11  ;;  %577 = vmatprep.subr.msk.mxu1 %vm28_vm0, %v17_v11 }
  0x2b   :  { %532 = vmatpush3.xpose.msk.msra.mxu0 %vm28_vm0, %v17_v11  ;;  %593 = vmatpush3.xpose.msk.msra.mxu1 %vm28_vm0, %v17_v11 }
  0x2c   :  { %533 = vmatprep.subr.msk.mxu0 %vm28_vm0, %v16_v12  ;;  %578 = vmatprep.subr.msk.mxu1 %vm28_vm0, %v16_v12 }
  0x2f   :  { %534 = vmatpush3.xpose.msk.msra.mxu0 %vm28_vm0, %v16_v12  ;;  %594 = vmatpush3.xpose.msk.msra.mxu1 %vm28_vm0, %v16_v12 }
  0x30   :  { %535 = vmatprep.subr.msk.mxu0 %vm28_vm0, %v15_v13  ;;  %579 = vmatprep.subr.msk.mxu1 %vm28_vm0, %v15_v13 }
  0x33   :  { %536 = vmatpush3.xpose.msk.msra.mxu0 %vm28_vm0, %v15_v13  ;;  %595 = vmatpush3.xpose.msk.msra.mxu1 %vm28_vm0, %v15_v13 }
  0x34   :  { %537 = vmatprep.subr.msk.mxu0 %vm28_vm0, %v14_v14  ;;  %580 = vmatprep.subr.msk.mxu1 %vm28_vm0, %v14_v14 }
  0x37   :  { %538 = vmatpush3.xpose.msk.msra.mxu0 %vm28_vm0, %v14_v14  ;;  %596 = vmatpush3.xpose.msk.msra.mxu1 %vm28_vm0, %v14_v14 }
  0x38   :  { %539 = vmatprep.subr.msk.mxu0 %vm28_vm0, %v13_v15  ;;  %581 = vmatprep.subr.msk.mxu1 %vm28_vm0, %v13_v15 }
  0x3b   :  { %540 = vmatpush3.xpose.msk.msra.mxu0 %vm28_vm0, %v13_v15  ;;  %597 = vmatpush3.xpose.msk.msra.mxu1 %vm28_vm0, %v13_v15 }
  0x3c   :  { %541 = vmatprep.subr.msk.mxu0 %vm28_vm0, %v718_v4  ;;  %582 = vmatprep.subr.msk.mxu1 %vm28_vm0, %v718_v4 }
  0x3f   :  { %542 = vmatpush3.xpose.msk.msra.mxu0 %vm28_vm0, %v718_v4  ;;  %598 = vmatpush3.xpose.msk.msra.mxu1 %vm28_vm0, %v718_v4 }
  0x42   :  { %544 = vmatmul.mubr.msk.f32.vlgmr.msra.gmra.mxu0 %vm28_vm0, %v13_v15  ;;  %556 = vmatmul.mubr.msk.f32.vlgmr.msra.gmra.mxu1 %vm28_vm0, %v21_v8 }
  0x43   :  { %546 = vmatprep.mubr.msk.f32.mxu0 %vm28_vm0, %v14_v14  ;;  %558 = vmatprep.mubr.msk.f32.mxu1 %vm28_vm0, %v22_v7 }
  0x46   :  { %547 = vmatmul.mubr.msk.f32.gmra.mxu0 %vm28_vm0, %v15_v13  ;;  %559 = vmatmul.mubr.msk.f32.gmra.mxu1 %vm28_vm0, %v738_v6 }
  0x47   :  { %549 = vmatprep.mubr.msk.f32.mxu0 %vm28_vm0, %v16_v12  ;;  %561 = vmatprep.mubr.msk.f32.mxu1 %vm28_vm0, %v723_v5 }
  0x4a   :  { %550 = vmatmul.mubr.msk.f32.gmra.mxu0 %vm28_vm0, %v17_v11  ;;  %562 = vmatmul.mubr.msk.f32.gmra.mxu1 %vm28_vm0, %v704_v3 }
  0x4b   :  { %552 = vmatprep.mubr.msk.f32.mxu0 %vm28_vm0, %v18_v10  ;;  %564 = vmatprep.mubr.msk.f32.mxu1 %vm28_vm0, %v684_v1  ;;  %v347_v1 = vld [vmem:[%s966_s1 + $0x28] sm:$0xff] }
  0x4c   :  { %vm363_vm10 = vcmp.ne.s32.totalorder %v347_v1, 0 }
  0x4e   :  { %553 = vmatmul.mubr.msk.f32.gmra.mxu0 %vm28_vm0, %v19_v9  ;;  %565 = vmatmul.mubr.msk.f32.gmra.mxu1 %vm28_vm0, %v679_v0 }
 0x102   :  { %v545_v16 = vpop.f32.mrf.mxu0  ;;  %v557_v17 = vpop.f32.mrf.mxu1 }
 0x103   :  { %v223_v18 = vmul.f32 2.0, %v545_v16  ;;  %v231_v53 = vmul.f32 2.0, %v557_v17 }
 0x104   :  { %v143_v19 = vpop.f32.mrf.mxu0  ;;  %v183_v20 = vpop.f32.mrf.mxu1 }
 0x105   :  { %v240_v21 = vmul.f32 1.442695, %v223_v18  ;;  %v222_v22 = vmul.f32 2.0, %v143_v19  ;;  %v230_v45 = vmul.f32 2.0, %v183_v20  ;;  %v256_v3 = vmul.f32 1.442695, %v231_v53 }
 0x106   :  { %v548_v24 = vpop.f32.mrf.mxu0  ;;  %v560_v25 = vpop.f32.mrf.mxu1  ;;  %v278_v18 = vadd.s32 56, %v846_v32 }
 0x107   :  { %v238_v26 = vmul.f32 1.442695, %v222_v22  ;;  %v225_v27 = vmul.f32 2.0, %v548_v24  ;;  %601 = vpow2.f32 %v240_v21  ;;  %v254_v60 = vmul.f32 1.442695, %v230_v45 }
 0x108   :  { %v153_v28 = vpop.f32.mrf.mxu0  ;;  %v193_v29 = vpop.f32.mrf.mxu1  ;;  %v233_v62 = vmul.f32 2.0, %v560_v25  ;;  %v277_v25 = vadd.s32 48, %v846_v32  ;;  %vm296_vm13 = vcmp.eq.s32.totalorder %v278_v18, %v849_v41 }
 0x109   :  { %603 = vpow2.f32 %v238_v26  ;;  %v244_v30 = vmul.f32 1.442695, %v225_v27  ;;  %v224_v31 = vmul.f32 2.0, %v153_v28  ;;  %v232_v57 = vmul.f32 2.0, %v193_v29  ;;  %v348_v29 = vld [vmem:[%s966_s1 + $0x30] sm:$0xff] }
 0x10a   :  { %v551_v33 = vpop.f32.mrf.mxu0  ;;  %v563_v37 = vpop.f32.mrf.mxu1  ;;  %v260_v9 = vmul.f32 1.442695, %v233_v62  ;;  %vm295_vm14 = vcmp.eq.s32.totalorder %v277_v25, %v849_v41  ;;  %vm364_vm15 = vcmp.ne.s32.totalorder %v348_v29, 0  ;;  %v282_v62 = vadd.s32 88, %v846_v32 }
 0x10b   :  { %v242_v34 = vmul.f32 1.442695, %v224_v31  ;;  %v227_v35 = vmul.f32 2.0, %v551_v33  ;;  %605 = vpow2.f32 %v244_v30  ;;  %v258_v5 = vmul.f32 1.442695, %v232_v57 }
 0x10c   :  { %v163_v36 = vpop.f32.mrf.mxu0  ;;  %v203_v49 = vpop.f32.mrf.mxu1  ;;  %v235_v14 = vmul.f32 2.0, %v563_v37 }
 0x10d   :  { %607 = vpow2.f32 %v242_v34  ;;  %v248_v38 = vmul.f32 1.442695, %v227_v35  ;;  %v226_v39 = vmul.f32 2.0, %v163_v36  ;;  %v234_v8 = vmul.f32 2.0, %v203_v49 }
 0x10e   :  { %v554_v42 = vpop.f32.mrf.mxu0  ;;  %v566_v63 = vpop.f32.mrf.mxu1  ;;  %v264_v30 = vmul.f32 1.442695, %v235_v14  ;;  %v279_v36 = vadd.s32 64, %v846_v32 }
 0x10f   :  { %v246_v43 = vmul.f32 1.442695, %v226_v39  ;;  %v229_v44 = vmul.f32 2.0, %v554_v42  ;;  %609 = vpow2.f32 %v248_v38  ;;  %v262_v21 = vmul.f32 1.442695, %v234_v8  ;;  %v349_v39 = vld [vmem:[%s966_s1 + $0x38] sm:$0xff] }
 0x110   :  { %v173_v48 = vpop.f32.mrf.mxu0  ;;  %v213_v10 = vpop.f32.mrf.mxu1  ;;  %v237_v31 = vmul.f32 2.0, %v566_v63  ;;  %vm365_vm0 = vcmp.ne.s32.totalorder %v349_v39, 0  ;;  %v352_v63 = vld [vmem:[%s966_s1 + $0x50] sm:$0xff] }
 0x111   :  { %611 = vpow2.f32 %v246_v43  ;;  %v252_v51 = vmul.f32 1.442695, %v229_v44  ;;  %v228_v52 = vmul.f32 2.0, %v173_v48  ;;  %v236_v22 = vmul.f32 2.0, %v213_v10 }
 0x112   :  { %v268_v48 = vmul.f32 1.442695, %v237_v31 }
 0x113   :  { %v250_v59 = vmul.f32 1.442695, %v228_v52  ;;  %613 = vpow2.f32 %v252_v51  ;;  %v266_v40 = vmul.f32 1.442695, %v236_v22  ;;  %v280_v52 = vadd.s32 72, %v846_v32 }
 0x114   :  { %v602_v0 = vpop.eup %601 }
 0x115   :  { %615 = vpow2.f32 %v250_v59  ;;  %v306_v12 = vsel %vm290_vm1, %v602_v0, 0.0  ;;  %v375_v13 = vsel %vm359_vm2, %v602_v0, 0.0  ;;  %vm297_vm1 = vcmp.eq.s32.totalorder %v279_v36, %v849_v41 }
 0x116   :  { %v604_v4 = vpop.eup %603  ;;  %617 = vpow2.f32 %v254_v60  ;;  %vm366_vm2 = vcmp.ne.s32.totalorder %v350_v47, 0  ;;  %v281_v59 = vadd.s32 80, %v846_v32 }
 0x117   :  { %v305_v6 = vsel %vm289_vm3, %v604_v4, 0.0  ;;  %v374_v7 = vsel %vm358_vm4, %v604_v4, 0.0  ;;  %619 = vpow2.f32 %v256_v3  ;;  %vm298_vm3 = vcmp.eq.s32.totalorder %v280_v52, %v849_v41 }
 0x118   :  { %v606_v11 = vpop.eup %605  ;;  %v321_v16 = vadd.f32 %v306_v12, %v305_v6  ;;  %v390_v17 = vadd.f32 %v375_v13, %v374_v7  ;;  %621 = vpow2.f32 %v258_v5  ;;  %vm367_vm4 = vcmp.ne.s32.totalorder %v351_v55, 0  ;;  %v353_v6 = vld [vmem:[%s966_s1 + $0x58] sm:$0xff]  ;;  %v354_v13 = vld [vmem:[%s966_s1 + $0x60] sm:$0xff] }
 0x119   :  { %623 = vpow2.f32 %v260_v9  ;;  %v308_v27 = vsel %vm292_vm5, %v606_v11, 0.0  ;;  %v377_v28 = vsel %vm361_vm6, %v606_v11, 0.0  ;;  %v283_v7 = vadd.s32 96, %v846_v32 }
 0x11a   :  { %v608_v15 = vpop.eup %607  ;;  %625 = vpow2.f32 %v262_v21  ;;  %vm299_vm5 = vcmp.eq.s32.totalorder %v281_v59, %v849_v41  ;;  %vm368_vm6 = vcmp.ne.s32.totalorder %v352_v63, 0 }
 0x11b   :  { %v307_v19 = vsel %vm291_vm7, %v608_v15, 0.0  ;;  %v376_v20 = vsel %vm360_vm8, %v608_v15, 0.0  ;;  %627 = vpow2.f32 %v264_v30  ;;  %vm300_vm7 = vcmp.eq.s32.totalorder %v282_v62, %v849_v41 }
 0x11c   :  { %v322_v23 = vadd.f32 %v321_v16, %v307_v19  ;;  %v391_v24 = vadd.f32 %v390_v17, %v376_v20  ;;  %v610_v26 = vpop.eup %609  ;;  %629 = vpow2.f32 %v266_v40  ;;  %vm369_vm8 = vcmp.ne.s32.totalorder %v353_v6, 0  ;;  %v355_v19 = vld [vmem:[%s966_s1 + $0x68] sm:$0xff] }
 0x11d   :  { %v310_v45 = vsel %vm294_vm9, %v610_v26, 0.0  ;;  %v379_v46 = vsel %vm363_vm10, %v610_v26, 0.0  ;;  %631 = vpow2.f32 %v268_v48  ;;  %v284_v16 = vadd.s32 104, %v846_v32  ;;  %v356_v26 = vld [vmem:[%s966_s1 + $0x70] sm:$0xff] }
 0x11e   :  { %v612_v33 = vpop.eup %611  ;;  %v323_v34 = vadd.f32 %v322_v23, %v308_v27  ;;  %v392_v35 = vadd.f32 %v391_v24, %v377_v28  ;;  %vm301_vm9 = vcmp.eq.s32.totalorder %v283_v7, %v849_v41  ;;  %vm370_vm10 = vcmp.ne.s32.totalorder %v354_v13, 0 }
 0x11f   :  { %v309_v37 = vsel %vm293_vm11, %v612_v33, 0.0  ;;  %v378_v38 = vsel %vm362_vm12, %v612_v33, 0.0  ;;  %v285_v23 = vadd.s32 112, %v846_v32  ;;  %vm302_vm11 = vcmp.eq.s32.totalorder %v284_v16, %v849_v41  ;;  %v357_v33 = vld [vmem:[%s966_s1 + $0x78] sm:$0xff]  ;;  %s659_s1 = smov 64  }
 0x120   :  { %v324_v42 = vadd.f32 %v323_v34, %v309_v37  ;;  %v393_v43 = vadd.f32 %v392_v35, %v378_v38  ;;  %v614_v44 = vpop.eup %613  ;;  %vm371_vm12 = vcmp.ne.s32.totalorder %v355_v19, 0  ;;  %v286_v34 = vadd.s32 120, %v846_v32 }
 0x121   :  { %v312_v60 = vsel %vm296_vm13, %v614_v44, 0.0  ;;  %v381_v61 = vsel %vm365_vm0, %v614_v44, 0.0  ;;  %vm303_vm13 = vcmp.eq.s32.totalorder %v285_v23, %v849_v41 }
 0x122   :  { %v616_v49 = vpop.eup %615  ;;  %v325_v50 = vadd.f32 %v324_v42, %v310_v45  ;;  %v394_v51 = vadd.f32 %v393_v43, %v379_v46  ;;  %vm304_vm0 = vcmp.eq.s32.totalorder %v286_v34, %v849_v41 }
 0x123   :  { %v311_v53 = vsel %vm295_vm14, %v616_v49, 0.0  ;;  %v380_v54 = vsel %vm364_vm15, %v616_v49, 0.0  ;;  %v618_v56 = vpop.eup %617  ;;  %vm372_vm14 = vcmp.ne.s32.totalorder %v356_v26, 0  ;;  %vm373_vm15 = vcmp.ne.s32.totalorder %v357_v33, 0 }
 0x124   :  { %v326_v57 = vadd.f32 %v325_v50, %v311_v53  ;;  %v395_v58 = vadd.f32 %v394_v51, %v380_v54  ;;  %v620_v0 = vpop.eup %619  ;;  %v313_v4 = vsel %vm297_vm1, %v618_v56, 0.0  ;;  %v382_v5 = vsel %vm366_vm2, %v618_v56, 0.0 }
 0x125   :  { %v622_v3 = vpop.eup %621  ;;  %v314_v11 = vsel %vm298_vm3, %v620_v0, 0.0  ;;  %v383_v12 = vsel %vm367_vm4, %v620_v0, 0.0  ;;  %vm423_vm1 = vcmp.lt.s32.totalorder %v849_v41, 61  ;;  %vm426_vm3 = vcmask 516096  }
 0x126   :  { %v327_v1 = vadd.f32 %v326_v57, %v312_v60  ;;  %v396_v2 = vadd.f32 %v395_v58, %v381_v61  ;;  %v624_v10 = vpop.eup %623  ;;  %v315_v17 = vsel %vm299_vm5, %v622_v3, 0.0  ;;  %v384_v18 = vsel %vm368_vm6, %v622_v3, 0.0 }
 0x127   :  { %v626_v20 = vpop.eup %625  ;;  %v316_v24 = vsel %vm300_vm7, %v624_v10, 0.0  ;;  %v385_v25 = vsel %vm369_vm8, %v624_v10, 0.0  ;;  %vm431_vm5 = vcmask 0  }
 0x128   :  { %v328_v8 = vadd.f32 %v327_v1, %v313_v4  ;;  %v397_v9 = vadd.f32 %v396_v2, %v382_v5  ;;  %v628_v27 = vpop.eup %627  ;;  %v317_v30 = vsel %vm301_vm9, %v626_v20, 0.0  ;;  %v386_v31 = vsel %vm370_vm10, %v626_v20, 0.0 }
 0x129   :  { %v630_v35 = vpop.eup %629  ;;  %v318_v38 = vsel %vm302_vm11, %v628_v27, 0.0  ;;  %v387_v39 = vsel %vm371_vm12, %v628_v27, 0.0 }
 0x12a   :  { %v329_v14 = vadd.f32 %v328_v8, %v314_v11  ;;  %v398_v15 = vadd.f32 %v397_v9, %v383_v12  ;;  %v632_v40 = vpop.eup %631  ;;  %v319_v44 = vsel %vm303_vm13, %v630_v35, 0.0  ;;  %v388_v45 = vsel %vm372_vm14, %v630_v35, 0.0 }
 0x12b   :  { %v389_v48 = vsel %vm373_vm15, %v632_v40, 0.0  ;;  %v320_v49 = vsel %vm304_vm0, %v632_v40, 0.0 }
 0x12c   :  { %v330_v21 = vadd.f32 %v329_v14, %v315_v17  ;;  %v399_v22 = vadd.f32 %v398_v15, %v384_v18 }
 0x12e   :  { %v331_v28 = vadd.f32 %v330_v21, %v316_v24  ;;  %v400_v29 = vadd.f32 %v399_v22, %v385_v25 }
 0x130   :  { %v332_v36 = vadd.f32 %v331_v28, %v317_v30  ;;  %v401_v37 = vadd.f32 %v400_v29, %v386_v31 }
 0x132   :  { %v333_v42 = vadd.f32 %v332_v36, %v318_v38  ;;  %v402_v43 = vadd.f32 %v401_v37, %v387_v39 }
 0x134   :  { %v334_v46 = vadd.f32 %v333_v42, %v319_v44  ;;  %v403_v47 = vadd.f32 %v402_v43, %v388_v45 }
 0x136   :  { %v404_v32 = vadd.f32 %v403_v47, %v389_v48  ;;  %v335_v51 = vadd.f32 %v334_v46, %v320_v49 }
 0x138   :  { %v405_v50 = vrot.slane %v404_v32, 4  ;;  %v336_v54 = vrot.slane %v335_v51, 4 }
 0x13a   :  { %v406_v52 = vadd.f32 %v405_v50, %v404_v32  ;;  %v337_v56 = vadd.f32 %v336_v54, %v335_v51 }
 0x13c   :  { %v407_v53 = vrot.slane %v406_v52, 2  ;;  %v338_v59 = vrot.slane %v337_v56, 2 }
 0x13e   :  { %v408_v55 = vadd.f32 %v407_v53, %v406_v52  ;;  %v339_v60 = vadd.f32 %v338_v59, %v337_v56 }
 0x140   :  { %v409_v57 = vrot.slane %v408_v55, 1  ;;  %v340_v61 = vrot.slane %v339_v60, 1 }
 0x142   :  { %v410_v58 = vadd.f32 %v409_v57, %v408_v55  ;;  %v341_v62 = vadd.f32 %v340_v61, %v339_v60 }
 0x144   :  { %633 = vrcp.f32 %v410_v58 }
 0x151   :  { %v634_v63 = vpop.eup %633 }
 0x152   :  { %v412_v0 = vmul.f32 %v634_v63, %v341_v62 }
 0x154   :  { %635 = vlog2.f32 %v412_v0 }
 0x161   :  { %v636_v1 = vpop.eup %635 }
 0x162   :  { %v414_v2 = vmul.f32 0.6931472, %v636_v1 }
 0x164   :  { %v415_v3 = vsub.f32 0.0, %v414_v2 }
 0x166   :  { %417 = vrot.lane.b32.xlu0 %v415_v3, %s659_s1 }
 0x1d8   :  { %v418_v4 = vpop.permute.xlu0 %417 }
 0x1d9   :  { %v420_v5 = vadd.f32 %v418_v4, %v415_v3 }
 0x1db   :  { %v421_v6 = vand.u32 2147483647, %v420_v5 }
 0x1dd   :  { %vm422_vm2 = vcmp.lt.f32.partialorder %v421_v6, inf }
 0x1de   :  { %vm424_vm4 = vmand %vm423_vm1, %vm422_vm2 }
 0x1df   :  { %v425_v7 = vsel %vm424_vm4, %v420_v5, 0.0 }
 0x1e0   :  { %v427_v8 = vsel %vm426_vm3, %v425_v7, 0.0 }
 0x1e1   :  { %428 = vadd.xlane.f32.xlu0 %v427_v8 }
 0x26a   :  { %v429_v9 = vpop.xlane.xlu0 %428 }
 0x26b   :  { %v430_v10 = vmul.f32 0.0078125, %v429_v9 }
 0x26d   :  { %432 = vst.msk [vmem:[#allocation2] sm:$0x1] %vm431_vm5, %v430_v10 }
 0x26e   :  { %648 = shalt.err (!%p645_p4)
}
 0x26f   :  { %442 = dma.vmem_to_hbm [thread:$0]  %s440_s16, 16, %s967_s2, [#allocation3]  }
 0x270   :  { %657 = dma.done.wait [#allocation3], 16  }
 0x271   :  { %658 = vsyncadd [#allocation3], 4294967280 }
 0x272   :  { %446 = vsyncpa [#allocation3], 1 }

</bundles_post_ra>
